<compile_context>
chip_gen: v6e
topology: v6e:2x2x1
jax: 0.10.0
libtpu: 0.0.40
codegen_flags: <defaults>
</compile_context>

<pallas_src>
import jax
import jax.numpy as jnp
from jax.experimental import pallas as pl
from jax.experimental.pallas import tpu as pltpu

# ---- problem sizes (small, consistent with the module) ----
BATCH = 2
Q_DIM = 32      # q_dim (embed dim of text_cls)
KV_DIM = 48     # kv_dim (channel dim of img_feats)
N_HEAD = 4
SEQ = 16        # length of img_feats
EPS = 1e-5      # nn.LayerNorm default eps
HEAD_DIM = Q_DIM // N_HEAD
SCALE = 1.0 / float(HEAD_DIM ** 0.5)   # per-head attention scale (folded into wq/bq)

# ---- merged parameter-slab layout (row offsets, 8-sublane aligned, 64 lanes wide) ----
def _r8(x):
    return (x + 7) // 8 * 8

W_COLS = 2 * Q_DIM                       # 64
R_WQ = 0                                 # wq^T*scale, zero-padded to 2Dq cols   [Dq , 2Dq]
R_WKV = _r8(R_WQ + Q_DIM)                # gamma-folded [wk;wv] (not transposed) [2Dq, Dkv]
R_WO = _r8(R_WKV + 2 * Q_DIM)            # wo^T in V-half rows, K-half rows zero [2Dq, Dq ]
R_W1 = _r8(R_WO + 2 * Q_DIM)             # w1^T                                  [Dq , 2Dq]
R_W2 = _r8(R_W1 + Q_DIM)                 # w2^T                                  [2Dq, Dq ]
R_POOL = _r8(R_W2 + 2 * Q_DIM)           # head mask over K lanes                [H  , 2Dq]
R_UNPOOL = _r8(R_POOL + N_HEAD)          # head mask over V lanes                [H  , 2Dq]
R_BKV = _r8(R_UNPOOL + N_HEAD)           # fused K|V bias (beta folded), column  [2Dq, 1  ]
R_VEC = _r8(R_BKV + 2 * Q_DIM)           # 8 packed 1-D parameter rows
W_ROWS = _r8(R_VEC + 8)                  # 344

# vector-row indices inside the R_VEC block
V_LNQ_W, V_LNQ_B, V_BQ, V_BO, V_LN2_W, V_LN2_B, V_B1, V_B2 = range(8)


# ----------------------- in-kernel math helpers -----------------------
def _erf(z):
    # TODO(synk): exact lax.erf may not lower in Mosaic; Abramowitz-Stegun 7.1.26
    # rational approximation (|err| < 1.5e-7, i.e. ~float32 noise).
    a1, a2, a3, a4, a5 = 0.254829592, -0.284496736, 1.421413741, -1.453152027, 1.061405429
    p = 0.3275911
    s = jnp.where(z >= 0.0, 1.0, -1.0)
    x = jnp.abs(z)
    t = 1.0 / (1.0 + p * x)
    poly = ((((a5 * t + a4) * t + a3) * t + a2) * t + a1) * t
    return s * (1.0 - poly * jnp.exp(-x * x))


def _gelu(x):
    # nn.GELU() default (exact / erf-based) form.
    return 0.5 * x * (1.0 + _erf(x * 0.7071067811865476))


def _layernorm(x, w, b):
    mu = jnp.mean(x, axis=-1, keepdims=True)
    var = jnp.mean((x - mu) ** 2, axis=-1, keepdims=True)
    return (x - mu) * jax.lax.rsqrt(var + EPS) * w + b


# ----------------------------- kernel ---------------------------------
def cross_attn_kernel(text_ref, img_ref, w_ref, out_ref):
    B = text_ref.shape[0]            # block batch
    Dq, Dkv, H = Q_DIM, KV_DIM, N_HEAD

    x = text_ref[...]                # [B, Dq]        original text_cls (residual)
    kv = img_ref[...]                # [B, Dkv, L]    PyTorch channels-first layout

    # ---- packed parameters (one VMEM slab) ----
    wq = w_ref[R_WQ:R_WQ + Dq, :]                        # [Dq, 2Dq]  (V-half cols zero)
    wkv = w_ref[R_WKV:R_WKV + 2 * Dq, :Dkv]              # [2Dq, Dkv] gamma folded
    wo = w_ref[R_WO:R_WO + 2 * Dq, :Dq]                  # [2Dq, Dq]  (K-half rows zero)
    w1 = w_ref[R_W1:R_W1 + Dq, :]                        # [Dq, 2Dq]
    w2 = w_ref[R_W2:R_W2 + 2 * Dq, :Dq]                  # [2Dq, Dq]
    pool = w_ref[R_POOL:R_POOL + H, :]                   # [H, 2Dq]   1s on K lanes of head h
    unpool = w_ref[R_UNPOOL:R_UNPOOL + H, :]             # [H, 2Dq]   1s on V lanes of head h
    bkv_col = w_ref[R_BKV:R_BKV + 2 * Dq, 0:1]           # [2Dq, 1]   beta-folded K|V bias
    vec = w_ref[R_VEC:R_VEC + 8, :]                      # [8, 2Dq]
    lnq_w = vec[V_LNQ_W:V_LNQ_W + 1, :Dq]
    lnq_b = vec[V_LNQ_B:V_LNQ_B + 1, :Dq]
    bq = vec[V_BQ:V_BQ + 1, :]                           # [1, 2Dq]  (already *scale, V half 0)
    bo = vec[V_BO:V_BO + 1, :Dq]
    ln2_w = vec[V_LN2_W:V_LN2_W + 1, :Dq]
    ln2_b = vec[V_LN2_B:V_LN2_B + 1, :Dq]
    b1 = vec[V_B1:V_B1 + 1, :]
    b2 = vec[V_B2:V_B2 + 1, :Dq]

    # ---- query path: ln_q_1 + q projection (scale folded, padded to 2Dq lanes) ----
    q_in = _layernorm(x, lnq_w, lnq_b)                                        # [B, Dq]
    q = jnp.dot(q_in, wq, preferred_element_type=jnp.float32) + bq            # [B, 2Dq]

    # ---- kv path: ln_kv_1 over channels (affine folded) + fused K|V projection ----
    mu = jnp.mean(kv, axis=1, keepdims=True)                                  # [B, 1, L]
    var = jnp.mean((kv - mu) ** 2, axis=1, keepdims=True)
    kv_hat = (kv - mu) * jax.lax.rsqrt(var + EPS)                             # [B, Dkv, L]

    # single batched contraction (no per-batch loop, no stack); channels-first result
    wkv_b = jnp.broadcast_to(wkv[None], (B, 2 * Dq, Dkv))
    kb = jnp.einsum('bqc,bcl->bql', wkv_b, kv_hat,
                    preferred_element_type=jnp.float32) + bkv_col[None]       # [B, 2Dq, L]

    # ---- multi-head attention (query length == 1), all heads at once ----
    qh = q[:, None, :] * pool[None, :, :]                                     # [B, H, 2Dq]
    s = jnp.einsum('bhd,bdl->bhl', qh, kb,
                   preferred_element_type=jnp.float32)                        # [B, H, L]
    s = s - jnp.max(s, axis=-1, keepdims=True)                                # softmax over L
    e = jnp.exp(s)
    p_attn = e * pl.reciprocal(jnp.sum(e, axis=-1, keepdims=True), approx=True)
    # attention dropout (p=0.1) is identity in eval mode

    pk = jnp.einsum('bhl,bdl->bhd', p_attn, kb,
                    preferred_element_type=jnp.float32)                       # [B, H, 2Dq]
    ctx = jnp.sum(pk * unpool[None, :, :], axis=1)                            # [B, 2Dq] (V half)

    # ---- output projection (extraction absorbed by zero-padded wo) + residual + MLP ----
    attn = jnp.dot(ctx, wo, preferred_element_type=jnp.float32) + bo          # [B, Dq]
    y = _layernorm(attn + x, ln2_w, ln2_b)                                    # [B, Dq]
    h1 = _gelu(jnp.dot(y, w1, preferred_element_type=jnp.float32) + b1)       # [B, 2Dq]
    out = jnp.dot(h1, w2, preferred_element_type=jnp.float32) + b2            # [B, Dq]

    out_ref[...] = out.astype(out_ref.dtype)


# ------------------- one-time parameter preprocessing -------------------
def prepare_params(p):
    """Transpose/fuse/fold all weights and pack them (plus the precomputed head masks)
    into ONE slab.  Called once, outside the per-call hot path."""
    w_stack = jnp.concatenate([p["wk"], p["wv"]], axis=0)                  # [2Dq, Dkv]
    wkv_nt = w_stack * p["ln_kv_w"][None, :]                               # gamma folded
    bkv = w_stack @ p["ln_kv_b"] + jnp.concatenate([p["bk"], p["bv"]])     # beta folded

    heads = jnp.arange(N_HEAD)[:, None]
    lanes = jnp.arange(2 * Q_DIM)[None, :]
    pool = ((lanes >= heads * HEAD_DIM) &
            (lanes < (heads + 1) * HEAD_DIM)).astype(jnp.float32)          # K-lane mask
    unpool = ((lanes >= Q_DIM + heads * HEAD_DIM) &
              (lanes < Q_DIM + (heads + 1) * HEAD_DIM)).astype(jnp.float32)  # V-lane mask

    w = jnp.zeros((W_ROWS, W_COLS), jnp.float32)
    w = w.at[R_WQ:R_WQ + Q_DIM, :Q_DIM].set(p["wq"].T * SCALE)
    w = w.at[R_WKV:R_WKV + 2 * Q_DIM, :KV_DIM].set(wkv_nt)
    w = w.at[R_WO + Q_DIM:R_WO + 2 * Q_DIM, :Q_DIM].set(p["wo"].T)   # K-half rows stay zero
    w = w.at[R_W1:R_W1 + Q_DIM, :].set(p["w1"].T)
    w = w.at[R_W2:R_W2 + 2 * Q_DIM, :Q_DIM].set(p["w2"].T)
    w = w.at[R_POOL:R_POOL + N_HEAD, :].set(pool)
    w = w.at[R_UNPOOL:R_UNPOOL + N_HEAD, :].set(unpool)
    w = w.at[R_BKV:R_BKV + 2 * Q_DIM, 0].set(bkv)
    w = w.at[R_VEC + V_LNQ_W, :Q_DIM].set(p["ln_q_w"])
    w = w.at[R_VEC + V_LNQ_B, :Q_DIM].set(p["ln_q_b"])
    w = w.at[R_VEC + V_BQ, :Q_DIM].set(p["bq"] * SCALE)               # V half stays zero
    w = w.at[R_VEC + V_BO, :Q_DIM].set(p["bo"])
    w = w.at[R_VEC + V_LN2_W, :Q_DIM].set(p["ln2_w"])
    w = w.at[R_VEC + V_LN2_B, :Q_DIM].set(p["ln2_b"])
    w = w.at[R_VEC + V_B1, :].set(p["b1"])
    w = w.at[R_VEC + V_B2, :Q_DIM].set(p["b2"])
    return w


# ----------------------------- wrapper ---------------------------------
@jax.jit
def cross_attention_block(text_cls, img_feats, slab):
    B, Dq = text_cls.shape
    _, Dkv, L = img_feats.shape

    # batch-block size: >=8 rows per block when possible (BlockSpec (8,128) rule),
    # else the full batch extent (single grid point at the demo size B=2).
    bb = B
    for cand in (256, 128, 64, 32, 16, 8):
        if B % cand == 0:
            bb = cand
            break
    grid = (B // bb,)

    return pl.pallas_call(
        cross_attn_kernel,
        out_shape=jax.ShapeDtypeStruct((B, Dq), jnp.float32),
        grid_spec=pltpu.PrefetchScalarGridSpec(
            num_scalar_prefetch=0,
            grid=grid,
            in_specs=[
                pl.BlockSpec((bb, Dq), lambda i: (i, 0)),
                pl.BlockSpec((bb, Dkv, L), lambda i: (i, 0, 0)),
                pl.BlockSpec((W_ROWS, W_COLS), lambda i: (0, 0)),   # slab: resident
            ],
            out_specs=pl.BlockSpec((bb, Dq), lambda i: (i, 0)),
        ),
        compiler_params=pltpu.CompilerParams(
            dimension_semantics=("parallel",)),   # uses both TensorCores on v7x for big B
    )(text_cls, img_feats, slab)


# ----------------------- deterministic parameters ----------------------
def init_params(key):
    ks = jax.random.split(key, 12)
    rnd = lambda k, shape, s=0.05: (s * jax.random.normal(k, shape)).astype(jnp.float32)
    return dict(
        ln_q_w=jnp.ones((Q_DIM,), jnp.float32),   ln_q_b=jnp.zeros((Q_DIM,), jnp.float32),
        ln_kv_w=jnp.ones((KV_DIM,), jnp.float32), ln_kv_b=jnp.zeros((KV_DIM,), jnp.float32),
        wq=rnd(ks[0], (Q_DIM, Q_DIM)),  wk=rnd(ks[1], (Q_DIM, KV_DIM)), wv=rnd(ks[2], (Q_DIM, KV_DIM)),
        bq=rnd(ks[3], (Q_DIM,)),        bk=rnd(ks[4], (Q_DIM,)),        bv=rnd(ks[5], (Q_DIM,)),
        wo=rnd(ks[6], (Q_DIM, Q_DIM)),  bo=rnd(ks[7], (Q_DIM,)),
        ln2_w=jnp.ones((Q_DIM,), jnp.float32), ln2_b=jnp.zeros((Q_DIM,), jnp.float32),
        w1=rnd(ks[8], (2 * Q_DIM, Q_DIM)), b1=rnd(ks[9], (2 * Q_DIM,)),
        w2=rnd(ks[10], (Q_DIM, 2 * Q_DIM)), b2=rnd(ks[11], (Q_DIM,)),
    )


# ---------------------- pure-JAX reference (check) ----------------------
def reference(text_cls, img_feats, p):
    img = jnp.transpose(img_feats, (0, 2, 1))
    def ln(v, w, b):
        mu = v.mean(-1, keepdims=True)
        var = ((v - mu) ** 2).mean(-1, keepdims=True)
        return (v - mu) / jnp.sqrt(var + EPS) * w + b
    q_in = ln(text_cls, p["ln_q_w"], p["ln_q_b"])[:, None, :]
    kv_in = ln(img, p["ln_kv_w"], p["ln_kv_b"])
    q = q_in @ p["wq"].T + p["bq"]
    k = kv_in @ p["wk"].T + p["bk"]
    v = kv_in @ p["wv"].T + p["bv"]
    B, _, Dq = q.shape
    L = k.shape[1]
    dh = Dq // N_HEAD
    qh = q.reshape(B, 1, N_HEAD, dh).transpose(0, 2, 1, 3)
    kh = k.reshape(B, L, N_HEAD, dh).transpose(0, 2, 1, 3)
    vh = v.reshape(B, L, N_HEAD, dh).transpose(0, 2, 1, 3)
    s = (qh / jnp.sqrt(dh)) @ kh.transpose(0, 1, 3, 2)
    pr = jax.nn.softmax(s, axis=-1)
    ctx = (pr @ vh).transpose(0, 2, 1, 3).reshape(B, 1, Dq)[:, 0]
    attn = ctx @ p["wo"].T + p["bo"]
    y = ln(attn + text_cls, p["ln2_w"], p["ln2_b"])
    h = jax.nn.gelu(y @ p["w1"].T + p["b1"], approximate=False)
    return h @ p["w2"].T + p["b2"]


if __name__ == "__main__":
    key = jax.random.PRNGKey(0)
    k1, k2, k3 = jax.random.split(key, 3)
    text_cls = jax.random.normal(k1, (BATCH, Q_DIM), dtype=jnp.float32)
    img_feats = jax.random.normal(k2, (BATCH, KV_DIM, SEQ), dtype=jnp.float32)
    params = init_params(k3)

    # one-time prep (hoisted out of the per-call hot path)
    slab = jax.block_until_ready(prepare_params(params))

    out = cross_attention_block(text_cls, img_feats, slab)
    out = jax.block_until_ready(out)

    ref = reference(text_cls, img_feats, params)
    assert out.shape == (BATCH, Q_DIM)
    assert bool(jnp.all(jnp.isfinite(out)))
    assert bool(jnp.allclose(out, ref, atol=1e-3, rtol=1e-3)), float(jnp.max(jnp.abs(out - ref)))
    print("KERNEL_OK")
</pallas_src>

<mosaic_0001>
module attributes {stable_mosaic.version = 11 : i64} {
  func.func @cross_attn_kernel(%arg0: i32, %arg1: memref<2x32xf32, #tpu.memory_space<vmem>>, %arg2: memref<2x48x16xf32, #tpu.memory_space<vmem>>, %arg3: memref<344x64xf32, #tpu.memory_space<vmem>>, %arg4: memref<2x32xf32, #tpu.memory_space<vmem>>) attributes {dimension_semantics = [#tpu.dimension_semantics<parallel>], iteration_bounds = array<i64: 1>, scalar_prefetch = 0 : i64, scratch_operands = 0 : i64, tpu.core_type = #tpu.core_type<tc>, window_params = [{transform_indices = @transform_0, window_bounds = array<i64: 2, 32>}, {transform_indices = @transform_1, window_bounds = array<i64: 2, 48, 16>}, {pipeline_mode = #tpu.pipeline_mode<synchronous>, transform_indices = @transform_2, window_bounds = array<i64: 344, 64>}, {transform_indices = @transform_3, window_bounds = array<i64: 2, 32>}]} {
    %c0 = arith.constant 0 : index
    %c0_0 = arith.constant 0 : index
    %0 = vector.load %arg1[%c0, %c0_0] : memref<2x32xf32, #tpu.memory_space<vmem>>, vector<2x32xf32>
    %c0_1 = arith.constant 0 : index
    %c0_2 = arith.constant 0 : index
    %c0_3 = arith.constant 0 : index
    %1 = vector.load %arg2[%c0_1, %c0_2, %c0_3] : memref<2x48x16xf32, #tpu.memory_space<vmem>>, vector<2x48x16xf32>
    %c0_4 = arith.constant 0 : index
    %c0_5 = arith.constant 0 : index
    %2 = vector.load %arg3[%c0_4, %c0_5] : memref<344x64xf32, #tpu.memory_space<vmem>>, vector<32x64xf32>
    %c32 = arith.constant 32 : index
    %c0_6 = arith.constant 0 : index
    %3 = vector.load %arg3[%c32, %c0_6] : memref<344x64xf32, #tpu.memory_space<vmem>>, vector<64x48xf32>
    %c96 = arith.constant 96 : index
    %c0_7 = arith.constant 0 : index
    %4 = vector.load %arg3[%c96, %c0_7] : memref<344x64xf32, #tpu.memory_space<vmem>>, vector<64x32xf32>
    %c160 = arith.constant 160 : index
    %c0_8 = arith.constant 0 : index
    %5 = vector.load %arg3[%c160, %c0_8] : memref<344x64xf32, #tpu.memory_space<vmem>>, vector<32x64xf32>
    %c192 = arith.constant 192 : index
    %c0_9 = arith.constant 0 : index
    %6 = vector.load %arg3[%c192, %c0_9] : memref<344x64xf32, #tpu.memory_space<vmem>>, vector<64x32xf32>
    %c256 = arith.constant 256 : index
    %c0_10 = arith.constant 0 : index
    %7 = vector.load %arg3[%c256, %c0_10] : memref<344x64xf32, #tpu.memory_space<vmem>>, vector<4x64xf32>
    %c264 = arith.constant 264 : index
    %c0_11 = arith.constant 0 : index
    %8 = vector.load %arg3[%c264, %c0_11] : memref<344x64xf32, #tpu.memory_space<vmem>>, vector<4x64xf32>
    %c272 = arith.constant 272 : index
    %c0_12 = arith.constant 0 : index
    %9 = vector.load %arg3[%c272, %c0_12] : memref<344x64xf32, #tpu.memory_space<vmem>>, vector<64x1xf32>
    %c336 = arith.constant 336 : index
    %c0_13 = arith.constant 0 : index
    %10 = vector.load %arg3[%c336, %c0_13] : memref<344x64xf32, #tpu.memory_space<vmem>>, vector<8x64xf32>
    %11 = vector.extract_strided_slice %10 {offsets = [0, 0], sizes = [1, 32], strides = [1, 1]} : vector<8x64xf32> to vector<1x32xf32>
    %12 = vector.extract_strided_slice %10 {offsets = [1, 0], sizes = [1, 32], strides = [1, 1]} : vector<8x64xf32> to vector<1x32xf32>
    %13 = vector.extract_strided_slice %10 {offsets = [2, 0], sizes = [1, 64], strides = [1, 1]} : vector<8x64xf32> to vector<1x64xf32>
    %14 = vector.extract_strided_slice %10 {offsets = [3, 0], sizes = [1, 32], strides = [1, 1]} : vector<8x64xf32> to vector<1x32xf32>
    %15 = vector.extract_strided_slice %10 {offsets = [4, 0], sizes = [1, 32], strides = [1, 1]} : vector<8x64xf32> to vector<1x32xf32>
    %16 = vector.extract_strided_slice %10 {offsets = [5, 0], sizes = [1, 32], strides = [1, 1]} : vector<8x64xf32> to vector<1x32xf32>
    %17 = vector.extract_strided_slice %10 {offsets = [6, 0], sizes = [1, 64], strides = [1, 1]} : vector<8x64xf32> to vector<1x64xf32>
    %18 = vector.extract_strided_slice %10 {offsets = [7, 0], sizes = [1, 32], strides = [1, 1]} : vector<8x64xf32> to vector<1x32xf32>
    %cst = arith.constant dense<0.000000e+00> : vector<2xf32>
    %19 = vector.multi_reduction <add>, %0, %cst [1] : vector<2x32xf32> to vector<2xf32>
    %20 = vector.shape_cast %19 : vector<2xf32> to vector<2x1xf32>
    %cst_14 = arith.constant 3.200000e+01 : f32
    %21 = vector.broadcast %cst_14 : f32 to vector<2x1xf32>
    %22 = arith.divf %20, %21 : vector<2x1xf32>
    %23 = vector.broadcast %22 : vector<2x1xf32> to vector<2x32xf32>
    %24 = arith.subf %0, %23 : vector<2x32xf32>
    %25 = arith.mulf %24, %24 : vector<2x32xf32>
    %cst_15 = arith.constant dense<0.000000e+00> : vector<2xf32>
    %26 = vector.multi_reduction <add>, %25, %cst_15 [1] : vector<2x32xf32> to vector<2xf32>
    %27 = vector.shape_cast %26 : vector<2xf32> to vector<2x1xf32>
    %cst_16 = arith.constant 3.200000e+01 : f32
    %28 = vector.broadcast %cst_16 : f32 to vector<2x1xf32>
    %29 = arith.divf %27, %28 : vector<2x1xf32>
    %30 = vector.broadcast %22 : vector<2x1xf32> to vector<2x32xf32>
    %31 = arith.subf %0, %30 : vector<2x32xf32>
    %cst_17 = arith.constant 9.99999974E-6 : f32
    %32 = vector.broadcast %cst_17 : f32 to vector<2x1xf32>
    %33 = arith.addf %29, %32 : vector<2x1xf32>
    %34 = math.rsqrt %33 : vector<2x1xf32>
    %35 = vector.broadcast %34 : vector<2x1xf32> to vector<2x32xf32>
    %36 = arith.mulf %31, %35 : vector<2x32xf32>
    %37 = vector.broadcast %11 : vector<1x32xf32> to vector<2x32xf32>
    %38 = arith.mulf %36, %37 : vector<2x32xf32>
    %39 = vector.broadcast %12 : vector<1x32xf32> to vector<2x32xf32>
    %40 = arith.addf %38, %39 : vector<2x32xf32>
    %cst_18 = arith.constant dense<0.000000e+00> : vector<2x64xf32>
    %41 = tpu.matmul %40, %2, %cst_18 {dimension_numbers = #tpu.dot_dimension_numbers<[1], [0], [0], [1], [0, 0, 1, 1], [], []>} : vector<2x32xf32>, vector<32x64xf32>, vector<2x64xf32> -> vector<2x64xf32>
    %42 = vector.broadcast %13 : vector<1x64xf32> to vector<2x64xf32>
    %43 = arith.addf %41, %42 : vector<2x64xf32>
    %cst_19 = arith.constant dense<0.000000e+00> : vector<2x16xf32>
    %44 = vector.multi_reduction <add>, %1, %cst_19 [1] : vector<2x48x16xf32> to vector<2x16xf32>
    %45 = vector.shape_cast %44 : vector<2x16xf32> to vector<2x1x16xf32>
    %cst_20 = arith.constant 4.800000e+01 : f32
    %46 = vector.broadcast %cst_20 : f32 to vector<2x1x16xf32>
    %47 = arith.divf %45, %46 : vector<2x1x16xf32>
    %48 = vector.broadcast %47 : vector<2x1x16xf32> to vector<2x48x16xf32>
    %49 = arith.subf %1, %48 : vector<2x48x16xf32>
    %50 = arith.mulf %49, %49 : vector<2x48x16xf32>
    %cst_21 = arith.constant dense<0.000000e+00> : vector<2x16xf32>
    %51 = vector.multi_reduction <add>, %50, %cst_21 [1] : vector<2x48x16xf32> to vector<2x16xf32>
    %52 = vector.shape_cast %51 : vector<2x16xf32> to vector<2x1x16xf32>
    %cst_22 = arith.constant 4.800000e+01 : f32
    %53 = vector.broadcast %cst_22 : f32 to vector<2x1x16xf32>
    %54 = arith.divf %52, %53 : vector<2x1x16xf32>
    %55 = vector.broadcast %47 : vector<2x1x16xf32> to vector<2x48x16xf32>
    %56 = arith.subf %1, %55 : vector<2x48x16xf32>
    %cst_23 = arith.constant 9.99999974E-6 : f32
    %57 = vector.broadcast %cst_23 : f32 to vector<2x1x16xf32>
    %58 = arith.addf %54, %57 : vector<2x1x16xf32>
    %59 = math.rsqrt %58 : vector<2x1x16xf32>
    %60 = vector.broadcast %59 : vector<2x1x16xf32> to vector<2x48x16xf32>
    %61 = arith.mulf %56, %60 : vector<2x48x16xf32>
    %62 = vector.shape_cast %3 : vector<64x48xf32> to vector<1x64x48xf32>
    %63 = vector.shape_cast %62 : vector<1x64x48xf32> to vector<1x64x48xf32>
    %64 = vector.broadcast %63 : vector<1x64x48xf32> to vector<2x64x48xf32>
    "tpu.trace_start"() <{level = 10 : i32, message = "bqc,bcl->bql"}> : () -> ()
    %cst_24 = arith.constant dense<0.000000e+00> : vector<2x64x16xf32>
    %65 = tpu.matmul %64, %61, %cst_24 {dimension_numbers = #tpu.dot_dimension_numbers<[2], [1], [1], [2], [0, 0, 0, 1, 1, 2], [0], [0]>} : vector<2x64x48xf32>, vector<2x48x16xf32>, vector<2x64x16xf32> -> vector<2x64x16xf32>
    "tpu.trace_stop"() : () -> ()
    %66 = vector.shape_cast %9 : vector<64x1xf32> to vector<1x64x1xf32>
    %67 = vector.broadcast %66 : vector<1x64x1xf32> to vector<2x64x16xf32>
    %68 = arith.addf %65, %67 : vector<2x64x16xf32>
    %69 = vector.shape_cast %43 : vector<2x64xf32> to vector<2x1x64xf32>
    %70 = vector.shape_cast %7 : vector<4x64xf32> to vector<1x4x64xf32>
    %71 = vector.broadcast %69 : vector<2x1x64xf32> to vector<2x4x64xf32>
    %72 = vector.broadcast %70 : vector<1x4x64xf32> to vector<2x4x64xf32>
    %73 = arith.mulf %71, %72 : vector<2x4x64xf32>
    "tpu.trace_start"() <{level = 10 : i32, message = "bhd,bdl->bhl"}> : () -> ()
    %cst_25 = arith.constant dense<0.000000e+00> : vector<2x4x16xf32>
    %74 = tpu.matmul %73, %68, %cst_25 {dimension_numbers = #tpu.dot_dimension_numbers<[2], [1], [1], [2], [0, 0, 0, 1, 1, 2], [0], [0]>} : vector<2x4x64xf32>, vector<2x64x16xf32>, vector<2x4x16xf32> -> vector<2x4x16xf32>
    "tpu.trace_stop"() : () -> ()
    %cst_26 = arith.constant dense<0xFF800000> : vector<2x4xf32>
    %75 = vector.multi_reduction <maximumf>, %74, %cst_26 [2] : vector<2x4x16xf32> to vector<2x4xf32>
    %76 = vector.shape_cast %75 : vector<2x4xf32> to vector<2x4x1xf32>
    %77 = vector.broadcast %76 : vector<2x4x1xf32> to vector<2x4x16xf32>
    %78 = arith.subf %74, %77 : vector<2x4x16xf32>
    %79 = math.exp %78 : vector<2x4x16xf32>
    %cst_27 = arith.constant dense<0.000000e+00> : vector<2x4xf32>
    %80 = vector.multi_reduction <add>, %79, %cst_27 [2] : vector<2x4x16xf32> to vector<2x4xf32>
    %81 = vector.shape_cast %80 : vector<2x4xf32> to vector<2x4x1xf32>
    %82 = tpu.reciprocal %81 {approx = true} : vector<2x4x1xf32> -> vector<2x4x1xf32>
    %83 = vector.broadcast %82 : vector<2x4x1xf32> to vector<2x4x16xf32>
    %84 = arith.mulf %79, %83 : vector<2x4x16xf32>
    "tpu.trace_start"() <{level = 10 : i32, message = "bhl,bdl->bhd"}> : () -> ()
    %cst_28 = arith.constant dense<0.000000e+00> : vector<2x4x64xf32>
    %85 = tpu.matmul %84, %68, %cst_28 {dimension_numbers = #tpu.dot_dimension_numbers<[2], [2], [1], [1], [0, 0, 0, 1, 1, 1], [0], [0]>} : vector<2x4x16xf32>, vector<2x64x16xf32>, vector<2x4x64xf32> -> vector<2x4x64xf32>
    "tpu.trace_stop"() : () -> ()
    %86 = vector.shape_cast %8 : vector<4x64xf32> to vector<1x4x64xf32>
    %87 = vector.broadcast %86 : vector<1x4x64xf32> to vector<2x4x64xf32>
    %88 = arith.mulf %85, %87 : vector<2x4x64xf32>
    %cst_29 = arith.constant dense<0.000000e+00> : vector<2x64xf32>
    %89 = vector.multi_reduction <add>, %88, %cst_29 [1] : vector<2x4x64xf32> to vector<2x64xf32>
    %cst_30 = arith.constant dense<0.000000e+00> : vector<2x32xf32>
    %90 = tpu.matmul %89, %4, %cst_30 {dimension_numbers = #tpu.dot_dimension_numbers<[1], [0], [0], [1], [0, 0, 1, 1], [], []>} : vector<2x64xf32>, vector<64x32xf32>, vector<2x32xf32> -> vector<2x32xf32>
    %91 = vector.broadcast %14 : vector<1x32xf32> to vector<2x32xf32>
    %92 = arith.addf %90, %91 : vector<2x32xf32>
    %93 = arith.addf %92, %0 : vector<2x32xf32>
    %cst_31 = arith.constant dense<0.000000e+00> : vector<2xf32>
    %94 = vector.multi_reduction <add>, %93, %cst_31 [1] : vector<2x32xf32> to vector<2xf32>
    %95 = vector.shape_cast %94 : vector<2xf32> to vector<2x1xf32>
    %cst_32 = arith.constant 3.200000e+01 : f32
    %96 = vector.broadcast %cst_32 : f32 to vector<2x1xf32>
    %97 = arith.divf %95, %96 : vector<2x1xf32>
    %98 = vector.broadcast %97 : vector<2x1xf32> to vector<2x32xf32>
    %99 = arith.subf %93, %98 : vector<2x32xf32>
    %100 = arith.mulf %99, %99 : vector<2x32xf32>
    %cst_33 = arith.constant dense<0.000000e+00> : vector<2xf32>
    %101 = vector.multi_reduction <add>, %100, %cst_33 [1] : vector<2x32xf32> to vector<2xf32>
    %102 = vector.shape_cast %101 : vector<2xf32> to vector<2x1xf32>
    %cst_34 = arith.constant 3.200000e+01 : f32
    %103 = vector.broadcast %cst_34 : f32 to vector<2x1xf32>
    %104 = arith.divf %102, %103 : vector<2x1xf32>
    %105 = vector.broadcast %97 : vector<2x1xf32> to vector<2x32xf32>
    %106 = arith.subf %93, %105 : vector<2x32xf32>
    %cst_35 = arith.constant 9.99999974E-6 : f32
    %107 = vector.broadcast %cst_35 : f32 to vector<2x1xf32>
    %108 = arith.addf %104, %107 : vector<2x1xf32>
    %109 = math.rsqrt %108 : vector<2x1xf32>
    %110 = vector.broadcast %109 : vector<2x1xf32> to vector<2x32xf32>
    %111 = arith.mulf %106, %110 : vector<2x32xf32>
    %112 = vector.broadcast %15 : vector<1x32xf32> to vector<2x32xf32>
    %113 = arith.mulf %111, %112 : vector<2x32xf32>
    %114 = vector.broadcast %16 : vector<1x32xf32> to vector<2x32xf32>
    %115 = arith.addf %113, %114 : vector<2x32xf32>
    %cst_36 = arith.constant dense<0.000000e+00> : vector<2x64xf32>
    %116 = tpu.matmul %115, %5, %cst_36 {dimension_numbers = #tpu.dot_dimension_numbers<[1], [0], [0], [1], [0, 0, 1, 1], [], []>} : vector<2x32xf32>, vector<32x64xf32>, vector<2x64xf32> -> vector<2x64xf32>
    %117 = vector.broadcast %17 : vector<1x64xf32> to vector<2x64xf32>
    %118 = arith.addf %116, %117 : vector<2x64xf32>
    %cst_37 = arith.constant 5.000000e-01 : f32
    %119 = vector.broadcast %cst_37 : f32 to vector<2x64xf32>
    %120 = arith.mulf %119, %118 : vector<2x64xf32>
    %cst_38 = arith.constant 0.707106769 : f32
    %121 = vector.broadcast %cst_38 : f32 to vector<2x64xf32>
    %122 = arith.mulf %118, %121 : vector<2x64xf32>
    %cst_39 = arith.constant 0.000000e+00 : f32
    %123 = vector.broadcast %cst_39 : f32 to vector<2x64xf32>
    %124 = arith.cmpf oge, %122, %123 : vector<2x64xf32>
    %cst_40 = arith.constant 1.000000e+00 : f32
    %cst_41 = arith.constant -1.000000e+00 : f32
    %125 = vector.broadcast %cst_40 : f32 to vector<2x64xf32>
    %126 = vector.broadcast %cst_41 : f32 to vector<2x64xf32>
    %127 = arith.select %124, %125, %126 : vector<2x64xi1>, vector<2x64xf32>
    %128 = math.absf %122 : vector<2x64xf32>
    %cst_42 = arith.constant 0.327591091 : f32
    %129 = vector.broadcast %cst_42 : f32 to vector<2x64xf32>
    %130 = arith.mulf %129, %128 : vector<2x64xf32>
    %cst_43 = arith.constant 1.000000e+00 : f32
    %131 = vector.broadcast %cst_43 : f32 to vector<2x64xf32>
    %132 = arith.addf %131, %130 : vector<2x64xf32>
    %cst_44 = arith.constant 1.000000e+00 : f32
    %133 = vector.broadcast %cst_44 : f32 to vector<2x64xf32>
    %134 = arith.divf %133, %132 : vector<2x64xf32>
    %cst_45 = arith.constant 1.06140542 : f32
    %135 = vector.broadcast %cst_45 : f32 to vector<2x64xf32>
    %136 = arith.mulf %135, %134 : vector<2x64xf32>
    %cst_46 = arith.constant -1.45315206 : f32
    %137 = vector.broadcast %cst_46 : f32 to vector<2x64xf32>
    %138 = arith.addf %136, %137 : vector<2x64xf32>
    %139 = arith.mulf %138, %134 : vector<2x64xf32>
    %cst_47 = arith.constant 1.42141378 : f32
    %140 = vector.broadcast %cst_47 : f32 to vector<2x64xf32>
    %141 = arith.addf %139, %140 : vector<2x64xf32>
    %142 = arith.mulf %141, %134 : vector<2x64xf32>
    %cst_48 = arith.constant -0.284496725 : f32
    %143 = vector.broadcast %cst_48 : f32 to vector<2x64xf32>
    %144 = arith.addf %142, %143 : vector<2x64xf32>
    %145 = arith.mulf %144, %134 : vector<2x64xf32>
    %cst_49 = arith.constant 0.254829586 : f32
    %146 = vector.broadcast %cst_49 : f32 to vector<2x64xf32>
    %147 = arith.addf %145, %146 : vector<2x64xf32>
    %148 = arith.mulf %147, %134 : vector<2x64xf32>
    %cst_50 = arith.constant 0.000000e+00 : f32
    %149 = vector.broadcast %cst_50 : f32 to vector<2x64xf32>
    %150 = arith.subf %149, %128 : vector<2x64xf32>
    %151 = arith.mulf %150, %128 : vector<2x64xf32>
    %152 = math.exp %151 : vector<2x64xf32>
    %153 = arith.mulf %148, %152 : vector<2x64xf32>
    %cst_51 = arith.constant 1.000000e+00 : f32
    %154 = vector.broadcast %cst_51 : f32 to vector<2x64xf32>
    %155 = arith.subf %154, %153 : vector<2x64xf32>
    %156 = arith.mulf %127, %155 : vector<2x64xf32>
    %cst_52 = arith.constant 1.000000e+00 : f32
    %157 = vector.broadcast %cst_52 : f32 to vector<2x64xf32>
    %158 = arith.addf %157, %156 : vector<2x64xf32>
    %159 = arith.mulf %120, %158 : vector<2x64xf32>
    %cst_53 = arith.constant dense<0.000000e+00> : vector<2x32xf32>
    %160 = tpu.matmul %159, %6, %cst_53 {dimension_numbers = #tpu.dot_dimension_numbers<[1], [0], [0], [1], [0, 0, 1, 1], [], []>} : vector<2x64xf32>, vector<64x32xf32>, vector<2x32xf32> -> vector<2x32xf32>
    %161 = vector.broadcast %18 : vector<1x32xf32> to vector<2x32xf32>
    %162 = arith.addf %160, %161 : vector<2x32xf32>
    %c0_54 = arith.constant 0 : index
    %c0_55 = arith.constant 0 : index
    %163 = vector.load %arg4[%c0_54, %c0_55] : memref<2x32xf32, #tpu.memory_space<vmem>>, vector<2x32xf32>
    tpu.vector_store %arg4[%c0_54, %c0_55], %162 {strides = array<i32>} : memref<2x32xf32, #tpu.memory_space<vmem>>, vector<2x32xf32>,
    return
  }
  func.func @transform_0(%arg0: i32) -> (i32, i32) {
    %c0_i32 = arith.constant 0 : i32
    %c0_i32_0 = arith.constant 0 : i32
    return %arg0, %c0_i32 : i32, i32
  }
  func.func @transform_1(%arg0: i32) -> (i32, i32, i32) {
    %c0_i32 = arith.constant 0 : i32
    %c0_i32_0 = arith.constant 0 : i32
    %c0_i32_1 = arith.constant 0 : i32
    return %arg0, %c0_i32, %c0_i32_0 : i32, i32, i32
  }
  func.func @transform_2(%arg0: i32) -> (i32, i32) {
    %c0_i32 = arith.constant 0 : i32
    %c0_i32_0 = arith.constant 0 : i32
    %c0_i32_1 = arith.constant 0 : i32
    return %c0_i32, %c0_i32_0 : i32, i32
  }
  func.func @transform_3(%arg0: i32) -> (i32, i32) {
    %c0_i32 = arith.constant 0 : i32
    %c0_i32_0 = arith.constant 0 : i32
    return %arg0, %c0_i32 : i32, i32
  }
}

</mosaic_0001>

<bundles_post_ra>
// kernel: cross_attention_block.1
= control target key start
LH: loop header
LB: loop body
LE: loop exit
PB: predicated region body
PF: predicated region fallthrough
CT: control target
= control target key end

     0   :  { %vm71_vm0 = vcmask 254976   ;;  %s2152_s0 = inlined_call_operand.vmem [shape: f32[2,32], index: 0, kind: input, shape index: {}]   ;;  %s2153_s1 = inlined_call_operand.vmem [shape: f32[2,48,16], index: 1, kind: input, shape index: {}]   ;;  %s2154_s2 = inlined_call_operand.vmem [shape: f32[344,64], index: 2, kind: input, shape index: {}]   ;;  %s2155_s3 = inlined_call_operand.hbm [shape: f32[2,32], index: 3, kind: output, shape index: {}]  }
   0x1   :  { %v1674_v0 = vld [vmem:[%s2152_s0] sm:$0x3] }
   0x2   :  { %8 = vsyncpa [#allocation3], 0  ;;  %v72_v1 = vsel %vm71_vm0, %v1674_v0, 0.0  ;;  %v22_v2 = vld [vmem:[%s2153_s1 + $0x30] sm:$0xff]  ;;  %v23_v3 = vld [vmem:[%s2153_s1 + $0x38] sm:$0xff]  ;;  %vm174_vm1 = vcmask 130048  }
   0x3   :  { %73 = vadd.xlane.f32.xlu0 %v72_v1  ;;  %v24_v4 = vld [vmem:[%s2153_s1 + $0x40] sm:$0xff]  ;;  %v25_v5 = vld [vmem:[%s2153_s1 + $0x48] sm:$0xff]  ;;  %v192_v6 = vsel %vm174_vm1, %v22_v2, 0.0  ;;  %v193_v7 = vsel %vm174_vm1, %v23_v3, 0.0  ;;  %v26_v9 = vld [vmem:[%s2153_s1 + $0x50] sm:$0xff]  ;;  %vm328_vm2 = vcmask 392192  }
   0x4   :  { %v195_v8 = vsel %vm174_vm1, %v24_v4, 0.0  ;;  %v194_v10 = vadd.f32 %v193_v7, %v192_v6  ;;  %v197_v11 = vsel %vm174_vm1, %v25_v5, 0.0  ;;  %v27_v12 = vld [vmem:[%s2153_s1 + $0x58] sm:$0xff]  ;;  %v199_v14 = vsel %vm174_vm1, %v26_v9, 0.0  ;;  %v16_v61 = vld [vmem:[%s2153_s1] sm:$0xff]  ;;  %v17_v62 = vld [vmem:[%s2153_s1 + $0x8] sm:$0xff] }
   0x5   :  { %v201_v16 = vsel %vm174_vm1, %v27_v12, 0.0  ;;  %v175_v63 = vsel %vm174_vm1, %v16_v61, 0.0  ;;  %v176_v1 = vsel %vm174_vm1, %v17_v62, 0.0  ;;  %vm1646_vm3 = vmmov 0  }
   0x6   :  { %v196_v13 = vadd.f32 %v195_v8, %v194_v10  ;;  %v20_v8 = vld [vmem:[%s2153_s1 + $0x20] sm:$0xff]  ;;  %vm100_vm4 = vcmask 261120   ;;  %vm598_vm5 = vcmask 523264   ;;  %vm745_vm6 = vcmask 125952  }
   0x7   :  { %v182_v10 = vsel %vm174_vm1, %v20_v8, 0.0  ;;  %vm964_vm7 = vcmask 519168   ;;  %vm985_vm8 = vcmask 1041409  }
   0x8   :  { %v198_v15 = vadd.f32 %v197_v11, %v196_v13  ;;  %v21_v11 = vld [vmem:[%s2153_s1 + $0x28] sm:$0xff] }
   0x9   :  { %v184_v13 = vsel %vm174_vm1, %v21_v11, 0.0 }
   0xa   :  { %v200_v17 = vadd.f32 %v199_v14, %v198_v15 }
   0xc   :  { %v202_v18 = vadd.f32 %v201_v16, %v200_v17 }
   0xe   :  { %v203_v19 = vrot.slane %v202_v18, 4 }
  0x10   :  { %v204_v20 = vadd.f32 %v203_v19, %v202_v18 }
  0x12   :  { %v205_v21 = vrot.slane %v204_v20, 2 }
  0x14   :  { %v206_v22 = vadd.f32 %v205_v21, %v204_v20 }
  0x16   :  { %v207_v23 = vrot.slane %v206_v22, 1 }
  0x18   :  { %v208_v24 = vadd.f32 %v207_v23, %v206_v22 }
  0x1a   :  { %v211_v25 = vmul.f32 0.020833334, %v208_v24 }
  0x1c   :  { %v1702_v26 = vsub.f32 %v22_v2, %v211_v25  ;;  %v1704_v27 = vsub.f32 %v23_v3, %v211_v25  ;;  %v1706_v28 = vsub.f32 %v24_v4, %v211_v25  ;;  %v221_v29 = vsub.f32 %v25_v5, %v211_v25  ;;  %v18_v2 = vld [vmem:[%s2153_s1 + $0x10] sm:$0xff]  ;;  %v19_v5 = vld [vmem:[%s2153_s1 + $0x18] sm:$0xff] }
  0x1d   :  { %v222_v30 = vsub.f32 %v26_v9, %v211_v25  ;;  %v223_v31 = vsub.f32 %v27_v12, %v211_v25  ;;  %v177_v3 = vadd.f32 %v176_v1, %v175_v63  ;;  %v178_v4 = vsel %vm174_vm1, %v18_v2, 0.0  ;;  %v1794_v1 = vld [vmem:[%s2154_s2 + $0x20] sm:$0xff] }
  0x1e   :  { %v230_v32 = vmul.f32 %v1702_v26, %v1702_v26  ;;  %v231_v33 = vmul.f32 %v1704_v27, %v1704_v27  ;;  %v232_v34 = vmul.f32 %v1706_v28, %v1706_v28  ;;  %v233_v35 = vmul.f32 %v221_v29, %v221_v29  ;;  %1458 = vmatprep.mubr.msk.f32.mxu0 %vm328_vm2, %v1794_v1 }
  0x1f   :  { %v234_v36 = vmul.f32 %v222_v30, %v222_v30  ;;  %v235_v41 = vmul.f32 %v223_v31, %v223_v31  ;;  %v179_v6 = vadd.f32 %v178_v4, %v177_v3  ;;  %v180_v7 = vsel %vm174_vm1, %v19_v5, 0.0  ;;  %v30_v3 = vld [vmem:[%s2154_s2 + $0x10] sm:$0xff]  ;;  %v1822_v4 = vld [vmem:[%s2154_s2 + $0x38] sm:$0xff] }
  0x20   :  { %v253_v37 = vsel %vm174_vm1, %v230_v32, 0.0  ;;  %v254_v38 = vsel %vm174_vm1, %v231_v33, 0.0  ;;  %v256_v39 = vsel %vm174_vm1, %v232_v34, 0.0  ;;  %v258_v42 = vsel %vm174_vm1, %v233_v35, 0.0 }
  0x21   :  { %v255_v40 = vadd.f32 %v254_v38, %v253_v37  ;;  %v260_v44 = vsel %vm174_vm1, %v234_v36, 0.0  ;;  %v262_v46 = vsel %vm174_vm1, %v235_v41, 0.0  ;;  %v181_v9 = vadd.f32 %v180_v7, %v179_v6  ;;  %v29_v6 = vld [vmem:[%s2154_s2 + $0x8] sm:$0xff]  ;;  %v28_v7 = vld [vmem:[%s2154_s2] sm:$0xff] }
  0x23   :  { %v257_v43 = vadd.f32 %v256_v39, %v255_v40  ;;  %v183_v12 = vadd.f32 %v182_v10, %v181_v9  ;;  %v1852_v9 = vld [vmem:[%s2154_s2 + $0x50] sm:$0xff]  ;;  %v1862_v10 = vld [vmem:[%s2154_s2 + $0x58] sm:$0xff] }
  0x25   :  { %v259_v45 = vadd.f32 %v258_v42, %v257_v43  ;;  %v185_v14 = vadd.f32 %v184_v13, %v183_v12 }
  0x27   :  { %v261_v47 = vadd.f32 %v260_v44, %v259_v45  ;;  %v186_v15 = vrot.slane %v185_v14, 4 }
  0x29   :  { %v263_v48 = vadd.f32 %v262_v46, %v261_v47  ;;  %v187_v16 = vadd.f32 %v186_v15, %v185_v14 }
  0x2b   :  { %v264_v49 = vrot.slane %v263_v48, 4  ;;  %v188_v17 = vrot.slane %v187_v16, 2 }
  0x2d   :  { %v265_v50 = vadd.f32 %v264_v49, %v263_v48  ;;  %v189_v18 = vadd.f32 %v188_v17, %v187_v16 }
  0x2f   :  { %v266_v51 = vrot.slane %v265_v50, 2  ;;  %v190_v19 = vrot.slane %v189_v18, 1 }
  0x31   :  { %v267_v52 = vadd.f32 %v266_v51, %v265_v50  ;;  %v191_v20 = vadd.f32 %v190_v19, %v189_v18  ;;  %v69_v18 = vld [vmem:[%s2154_s2 + $0x148] sm:$0xff]  ;;  %v1647_v19 = vmov 0  }
  0x32   :  { %1601 = vset.pattern.permute.xlu1 %v1647_v19  ;;  %1602 = vset.pattern.permute.xlu0 %v1647_v19 }
  0x33   :  { %v268_v53 = vrot.slane %v267_v52, 1  ;;  %v210_v21 = vmul.f32 0.020833334, %v191_v20  ;;  %v67_v20 = vld [vmem:[%s2154_s2 + $0x138] sm:$0xff]  ;;  %325 = vperm.xlu1 %1601, %v69_v18  }
  0x35   :  { %v269_v54 = vadd.f32 %v268_v53, %v267_v52  ;;  %v1749_v22 = vsub.f32 %v16_v61, %v210_v21  ;;  %v1751_v23 = vsub.f32 %v17_v62, %v210_v21  ;;  %v1753_v24 = vsub.f32 %v18_v2, %v210_v21  ;;  %v31_v2 = vld [vmem:[%s2154_s2 + $0x18] sm:$0xff] }
  0x36   :  { %v1765_v36 = vsub.f32 %v20_v8, %v210_v21  ;;  %v1770_v41 = vsub.f32 %v21_v11, %v210_v21  ;;  %v1847_v8 = vld [vmem:[%s2154_s2 + $0x48] sm:$0xff] }
  0x37   :  { %v271_v55 = vmul.f32 0.020833334, %v269_v54  ;;  %v224_v25 = vmul.f32 %v1749_v22, %v1749_v22 }
  0x38   :  { %v228_v42 = vmul.f32 %v1765_v36, %v1765_v36  ;;  %v229_v46 = vmul.f32 %v1770_v41, %v1770_v41 }
  0x39   :  { %v273_v56 = vadd.f32 1e-05, %v271_v55  ;;  %v236_v32 = vsel %vm174_vm1, %v224_v25, 0.0  ;;  %v63_v25 = vld [vmem:[%s2154_s2 + $0x118] sm:$0xff] }
  0x3a   :  { %v243_v47 = vsel %vm174_vm1, %v228_v42, 0.0  ;;  %v245_v50 = vsel %vm174_vm1, %v229_v46, 0.0 }
  0x3b   :  { %1603 = vrsqrt.f32 %v273_v56 }
  0x48   :  { %v1720_v57 = vpop.eup %1603 }
  0x49   :  { %v287_v58 = vmul.f32 %v1720_v57, %v223_v31  ;;  %v286_v59 = vmul.f32 %v1720_v57, %v222_v30  ;;  %v285_v60 = vmul.f32 %v1720_v57, %v221_v29  ;;  %v225_v29 = vmul.f32 %v1751_v23, %v1751_v23 }
  0x4a   :  { %v1759_v30 = vsub.f32 %v19_v5, %v210_v21  ;;  %v226_v31 = vmul.f32 %v1753_v24, %v1753_v24  ;;  %v282_v62 = vmul.f32 %v1720_v57, %v1702_v26  ;;  %v1827_v5 = vld [vmem:[%s2154_s2 + $0x40] sm:$0xff] }
  0x4b   :  { %1446 = vmatprep.subr.mxu0 %v287_v58  ;;  %v237_v33 = vsel %vm174_vm1, %v225_v29, 0.0  ;;  %v68_v21 = vld [vmem:[%s2154_s2 + $0x140] sm:$0xff]  ;;  %v62_v29 = vld [vmem:[%s2154_s2 + $0x110] sm:$0xff] }
  0x4c   :  { %1447 = vmatpush3.msra.mxu0 %v287_v58  ;;  %v238_v34 = vadd.f32 %v237_v33, %v236_v32  ;;  %v227_v37 = vmul.f32 %v1759_v30, %v1759_v30  ;;  %v239_v38 = vsel %vm174_vm1, %v226_v31, 0.0  ;;  %v284_v58 = vmul.f32 %v1720_v57, %v1706_v28  ;;  %v1799_v28 = vld [vmem:[%s2154_s2 + $0x28] sm:$0xff]  ;;  %320 = vperm.xlu1 %1601, %v68_v21  }
  0x4d   :  { %1448 = vmatprep.subr.mxu0 %v286_v59  ;;  %v86_v33 = vlaneseq }
  0x4e   :  { %1449 = vmatpush3.msra.mxu0 %v286_v59  ;;  %v240_v40 = vadd.f32 %v239_v38, %v238_v34  ;;  %v241_v43 = vsel %vm174_vm1, %v227_v37, 0.0 }
  0x4f   :  { %1450 = vmatprep.subr.mxu0 %v285_v60  ;;  %v1898_v34 = vshrl.u32 %v86_v33, 7 }
  0x50   :  { %1451 = vmatpush3.msra.mxu0 %v285_v60  ;;  %v242_v45 = vadd.f32 %v241_v43, %v240_v40  ;;  %v283_v60 = vmul.f32 %v1720_v57, %v1704_v27  ;;  %v1804_v27 = vld [vmem:[%s2154_s2 + $0x30] sm:$0xff]  ;;  %v1645_v57 = vmov 0.0  }
  0x51   :  { %1452 = vmatprep.subr.mxu0 %v284_v58  ;;  %1411 = vmatprep.subr.mxu1 %v1645_v57  ;;  %v93_v37 = vsub.s32 1, %v1898_v34 }
  0x52   :  { %v244_v49 = vadd.f32 %v243_v47, %v242_v45  ;;  %1453 = vmatpush3.msra.mxu0 %v284_v58  ;;  %1412 = vmatpush3.msra.mxu1 %v31_v2 }
  0x53   :  { %1454 = vmatprep.subr.mxu0 %v283_v60  ;;  %1413 = vmatprep.subr.mxu1 %v1645_v57 }
  0x54   :  { %v246_v52 = vadd.f32 %v245_v50, %v244_v49  ;;  %1455 = vmatpush3.msra.mxu0 %v283_v60  ;;  %1419 = vmatprep.mubr.msk.f32.mxu1 %vm1646_vm3, %v1645_v57 }
  0x55   :  { %1456 = vmatprep.subr.mxu0 %v282_v62  ;;  %1414 = vmatpush3.msra.mxu1 %v30_v3  ;;  %v1648_v3 = vmov 1966171168  }
  0x56   :  { %v247_v53 = vrot.slane %v246_v52, 4  ;;  %1457 = vmatpush3.msra.mxu0 %v282_v62  ;;  %1415 = vmatprep.subr.mxu1 %v1645_v57 }
  0x57   :  { %1459 = vmatmul.mubr.msk.f32.vlgmr.msra.gmra.mxu0 %vm328_vm2, %v1799_v28  ;;  %1489 = vmatprep.subr.mxu0 %v1645_v57 }
  0x58   :  { %v248_v54 = vadd.f32 %v247_v53, %v246_v52  ;;  %1461 = vmatprep.mubr.msk.f32.mxu0 %vm328_vm2, %v1804_v27  ;;  %1416 = vmatpush3.msra.mxu1 %v29_v6 }
  0x59   :  { %1417 = vmatprep.subr.mxu1 %v1645_v57 }
  0x5a   :  { %v249_v55 = vrot.slane %v248_v54, 2  ;;  %1418 = vmatpush3.msra.mxu1 %v28_v7 }
  0x5b   :  { %1462 = vmatmul.mubr.msk.f32.gmra.mxu0 %vm328_vm2, %v1822_v4 }
  0x5c   :  { %v250_v56 = vadd.f32 %v249_v55, %v248_v54  ;;  %1464 = vmatprep.mubr.msk.f32.mxu0 %vm328_vm2, %v1827_v5 }
  0x5e   :  { %v251_v59 = vrot.slane %v250_v56, 1 }
  0x5f   :  { %1465 = vmatmul.mubr.msk.f32.gmra.mxu0 %vm328_vm2, %v1847_v8 }
  0x60   :  { %v252_v61 = vadd.f32 %v251_v59, %v250_v56  ;;  %1467 = vmatprep.mubr.msk.f32.mxu0 %vm328_vm2, %v1852_v9 }
  0x62   :  { %v270_v63 = vmul.f32 0.020833334, %v252_v61 }
  0x63   :  { %1468 = vmatmul.mubr.msk.f32.gmra.mxu0 %vm328_vm2, %v1862_v10 }
  0x64   :  { %v272_v26 = vadd.f32 1e-05, %v270_v63  ;;  %1505 = vmatprep.mubr.msk.f32.mxu0 %vm1646_vm3, %v1645_v57 }
  0x66   :  { %1605 = vrsqrt.f32 %v272_v26 }
  0x73   :  { %v1606_v11 = vpop.eup %1605 }
  0x74   :  { %v281_v12 = vmul.f32 %v1606_v11, %v1770_v41  ;;  %v280_v13 = vmul.f32 %v1606_v11, %v1765_v36  ;;  %v279_v14 = vmul.f32 %v1606_v11, %v1759_v30  ;;  %v278_v15 = vmul.f32 %v1606_v11, %v1753_v24  ;;  %v64_v24 = vld [vmem:[%s2154_s2 + $0x120] sm:$0xff]  ;;  %v1906_v36 = vld [vmem:[%s2154_s2 + $0x150] sm:$0xff] }
  0x75   :  { %v277_v16 = vmul.f32 %v1606_v11, %v1751_v23  ;;  %v276_v17 = vmul.f32 %v1606_v11, %v1749_v22  ;;  %v66_v22 = vld [vmem:[%s2154_s2 + $0x130] sm:$0xff]  ;;  %v65_v23 = vld [vmem:[%s2154_s2 + $0x128] sm:$0xff]  ;;  %v94_v41 = vrot.slane %v1906_v36, %v93_v37 }
  0x76   :  { %1422 = vmatprep.subr.mxu1 %v281_v12  ;;  %310 = vperm.xlu1 %1601, %v66_v22  }
  0x7a   :  { %305 = vperm.xlu1 %1601, %v65_v23  }
  0x7e   :  { %300 = vperm.xlu1 %1601, %v64_v24  }
  0x82   :  { %295 = vperm.xlu1 %1601, %v63_v25  }
  0x86   :  { %290 = vperm.xlu1 %1601, %v62_v29  }
  0x8c   :  { %v74_v35 = vpop.xlane.xlu0 %73 }
  0x8d   :  { %v76_v39 = vmul.f32 0.03125, %v74_v35  ;;  %v1901_v35 = vsub.s32 0, %v1898_v34 }
  0x8f   :  { %v1776_v44 = vsub.f32 %v1674_v0, %v76_v39  ;;  %v89_v38 = vrot.slane %v1906_v36, %v1901_v35 }
  0x91   :  { %v78_v48 = vmul.f32 %v1776_v44, %v1776_v44 }
  0x93   :  { %v79_v51 = vsel %vm71_vm0, %v78_v48, 0.0 }
  0x94   :  { %80 = vadd.xlane.f32.xlu0 %v79_v51 }
  0xaa   :  { %315 = vperm.xlu0 %1602, %v67_v20  }
 0x117   :  { %v1460_v46 = vpop.f32.mrf.mxu0 }
 0x119   :  { %v524_v47 = vpop.f32.mrf.mxu0 }
 0x11b   :  { %v1463_v48 = vpop.f32.mrf.mxu0 }
 0x11d   :  { %v81_v30 = vpop.xlane.xlu0 %80  ;;  %v534_v50 = vpop.f32.mrf.mxu0 }
 0x11e   :  { %v82_v31 = vmul.f32 0.03125, %v81_v30 }
 0x11f   :  { %v1466_v51 = vpop.f32.mrf.mxu0 }
 0x120   :  { %v83_v32 = vadd.f32 1e-05, %v82_v31 }
 0x121   :  { %v544_v52 = vpop.f32.mrf.mxu0 }
 0x122   :  { %1607 = vrsqrt.f32 %v83_v32 }
 0x123   :  { %v1469_v54 = vpop.f32.mrf.mxu0 }
 0x125   :  { %v1941_v55 = vpop.permute.xlu0 %315  ;;  %v554_v58 = vpop.f32.mrf.mxu0 }
 0x126   :  { %v550_v60 = vadd.f32 %v1466_v51, %v1941_v55 }
 0x12f   :  { %v1608_v39 = vpop.eup %1607 }
 0x130   :  { %v85_v40 = vmul.f32 %v1608_v39, %v1776_v44  ;;  %v1933_v44 = vpop.permute.xlu1 %325 }
 0x131   :  { %v560_v56 = vadd.f32 %v1469_v54, %v1933_v44 }
 0x132   :  { %v90_v42 = vmul.f32 %v89_v38, %v85_v40 }
 0x133   :  { %1490 = vmatpush3.msra.mxu0 %v560_v56 }
 0x134   :  { %v95_v43 = vadd.f32 %v94_v41, %v90_v42  ;;  %v1935_v45 = vpop.permute.xlu1 %320  ;;  %1491 = vmatprep.subr.mxu0 %v1645_v57 }
 0x135   :  { %v555_v59 = vadd.f32 %v554_v58, %v1935_v45 }
 0x136   :  { %1420 = vmatmul.mubr.msk.f32.vlgmr.msra.gmra.mxu1 %vm100_vm4, %v95_v43 }
 0x137   :  { %1423 = vmatpush3.msra.mxu1 %v281_v12  ;;  %1434 = vmatprep.mubr.msk.f32.mxu1 %vm328_vm2, %v1794_v1 }
 0x138   :  { %1424 = vmatprep.subr.mxu1 %v280_v13  ;;  %v1937_v49 = vpop.permute.xlu1 %310  ;;  %1492 = vmatpush3.msra.mxu0 %v555_v59 }
 0x139   :  { %1425 = vmatpush3.msra.mxu1 %v280_v13  ;;  %v545_v61 = vadd.f32 %v544_v52, %v1937_v49  ;;  %1493 = vmatprep.subr.mxu0 %v1645_v57 }
 0x13a   :  { %1426 = vmatprep.subr.mxu1 %v279_v14  ;;  %1494 = vmatpush3.msra.mxu0 %v550_v60 }
 0x13b   :  { %1427 = vmatpush3.msra.mxu1 %v279_v14  ;;  %1495 = vmatprep.subr.mxu0 %v1645_v57 }
 0x13c   :  { %1428 = vmatprep.subr.mxu1 %v278_v15  ;;  %v1939_v53 = vpop.permute.xlu1 %305  ;;  %1496 = vmatpush3.msra.mxu0 %v545_v61 }
 0x13d   :  { %1429 = vmatpush3.msra.mxu1 %v278_v15  ;;  %v540_v63 = vadd.f32 %v1463_v48, %v1939_v53  ;;  %1497 = vmatprep.subr.mxu0 %v1645_v57 }
 0x13e   :  { %1430 = vmatprep.subr.mxu1 %v277_v16 }
 0x13f   :  { %1431 = vmatpush3.msra.mxu1 %v277_v16  ;;  %1498 = vmatpush3.msra.mxu0 %v540_v63  ;;  %v60_v16 = vld [vmem:[%s2154_s2 + $0x100] sm:$0xf] }
 0x140   :  { %1432 = vmatprep.subr.mxu1 %v276_v17  ;;  %v1948_v62 = vpop.permute.xlu1 %300  ;;  %1499 = vmatprep.subr.mxu0 %v1645_v57 }
 0x141   :  { %1433 = vmatpush3.msra.mxu1 %v276_v17  ;;  %v1954_v1 = vadd.f32 %v534_v50, %v1948_v62 }
 0x142   :  { %1435 = vmatmul.mubr.msk.f32.vlgmr.msra.gmra.mxu1 %vm328_vm2, %v1799_v28  ;;  %1470 = vmatprep.subr.mxu1 %v1645_v57 }
 0x143   :  { %1437 = vmatprep.mubr.msk.f32.mxu1 %vm328_vm2, %v1804_v27  ;;  %1500 = vmatpush3.msra.mxu0 %v1954_v1 }
 0x144   :  { %v1957_v28 = vpop.permute.xlu1 %295  ;;  %1501 = vmatprep.subr.mxu0 %v1645_v57 }
 0x145   :  { %v1962_v27 = vadd.f32 %v1460_v46, %v1957_v28 }
 0x146   :  { %1438 = vmatmul.mubr.msk.f32.gmra.mxu1 %vm328_vm2, %v1822_v4  ;;  %v565_v4 = vunpack.c.l.s4 %v1648_v3  ;;  %v43_v3 = vld [vmem:[%s2154_s2 + $0x78] sm:$0xff] }
 0x147   :  { %1440 = vmatprep.mubr.msk.f32.mxu1 %vm328_vm2, %v1827_v5  ;;  %1502 = vmatpush3.msra.mxu0 %v1962_v27  ;;  %v98_v5 = vsub.s32 2, %v1898_v34 }
 0x148   :  { %v1965_v26 = vpop.permute.xlu1 %290  ;;  %1503 = vmatprep.subr.mxu0 %v1645_v57  ;;  %v566_v6 = vunpack.c.0.s8 %v565_v4  ;;  %v42_v4 = vld [vmem:[%s2154_s2 + $0x70] sm:$0xff] }
 0x149   :  { %v1968_v2 = vadd.f32 %v524_v47, %v1965_v26  ;;  %v99_v7 = vrot.slane %v1906_v36, %v98_v5  ;;  %v41_v5 = vld [vmem:[%s2154_s2 + $0x68] sm:$0xff] }
 0x14a   :  { %1441 = vmatmul.mubr.msk.f32.gmra.mxu1 %vm328_vm2, %v1847_v8  ;;  %v569_v8 = vsub.s32 %v566_v6, %v1898_v34  ;;  %v40_v6 = vld [vmem:[%s2154_s2 + $0x60] sm:$0xff] }
 0x14b   :  { %1443 = vmatprep.mubr.msk.f32.mxu1 %vm328_vm2, %v1852_v9  ;;  %1504 = vmatpush3.msra.mxu0 %v1968_v2 }
 0x14c   :  { %1527 = vmatprep.subr.mxu0 %v1645_v57 }
 0x14e   :  { %1444 = vmatmul.mubr.msk.f32.gmra.mxu1 %vm328_vm2, %v1862_v10 }
 0x14f   :  { %1486 = vmatprep.mubr.msk.f32.mxu1 %vm1646_vm3, %v1645_v57 }
 0x1f6   :  { %v170_v9 = vpop.f32.mrf.mxu1 }
 0x1f7   :  { %v171_v10 = vadd.f32 %v170_v9, %v99_v7  ;;  %v61_v7 = vld [vmem:[%s2154_s2 + $0x108] sm:$0xf] }
 0x1f8   :  { %v1421_v11 = vpop.f32.mrf.mxu1 }
 0x1f9   :  { %v570_v12 = vrot.slane %v171_v10, %v569_v8 }
 0x1fb   :  { %v571_v13 = vcombine.high %v570_v12, %v570_v12  ;;  %v578_v33 = vrot.slane %v570_v12, %v569_v8 }
 0x1fd   :  { %v585_v14 = vrot.slane %v571_v13, %v569_v8  ;;  %v589_v39 = vrot.slane %v578_v33, %v1901_v35 }
 0x1ff   :  { %v593_v15 = vrot.slane %v585_v14, %v1901_v35  ;;  %v596_v42 = vmul.f32 %v589_v39, %v60_v16 }
 0x201   :  { %v597_v17 = vmul.f32 %v593_v15, %v60_v16 }
 0x202   :  { %v1436_v18 = vpop.f32.mrf.mxu1 }
 0x203   :  { %1506 = vmatmul.mubr.msk.f32.vlgmr.msra.gmra.mxu0 %vm598_vm5, %v597_v17  ;;  %v425_v40 = vadd.f32 %v1436_v18, %v1957_v28  ;;  %v47_v28 = vld [vmem:[%s2154_s2 + $0x98] sm:$0xff] }
 0x204   :  { %v419_v19 = vpop.f32.mrf.mxu1  ;;  %1528 = vmatpush3.xpose.msk.msra.mxu0 %vm174_vm1, %v560_v56  ;;  %1543 = vmatprep.mubr.msk.f32.mxu0 %vm1646_vm3, %v1645_v57 }
 0x205   :  { %1529 = vmatprep.subr.mxu0 %v1645_v57  ;;  %v420_v41 = vadd.f32 %v419_v19, %v1965_v26  ;;  %v45_v26 = vld [vmem:[%s2154_s2 + $0x88] sm:$0xff] }
 0x206   :  { %v1439_v20 = vpop.f32.mrf.mxu1 }
 0x207   :  { %v435_v37 = vadd.f32 %v1439_v20, %v1939_v53 }
 0x208   :  { %v429_v21 = vpop.f32.mrf.mxu1  ;;  %1530 = vmatpush3.xpose.msk.msra.mxu0 %vm174_vm1, %v555_v59 }
 0x209   :  { %1531 = vmatprep.subr.mxu0 %v1645_v57  ;;  %v430_v38 = vadd.f32 %v429_v21, %v1948_v62 }
 0x20a   :  { %v1442_v22 = vpop.f32.mrf.mxu1 }
 0x20b   :  { %v445_v31 = vadd.f32 %v1442_v22, %v1941_v55 }
 0x20c   :  { %v439_v23 = vpop.f32.mrf.mxu1  ;;  %1532 = vmatpush3.xpose.msk.msra.mxu0 %vm174_vm1, %v550_v60 }
 0x20d   :  { %1533 = vmatprep.subr.mxu0 %v1645_v57  ;;  %v440_v32 = vadd.f32 %v439_v23, %v1937_v49 }
 0x20e   :  { %v1445_v24 = vpop.f32.mrf.mxu1 }
 0x20f   :  { %v455_v25 = vadd.f32 %v1445_v24, %v1933_v44 }
 0x210   :  { %v449_v29 = vpop.f32.mrf.mxu1  ;;  %1534 = vmatpush3.xpose.msk.msra.mxu0 %vm174_vm1, %v545_v61 }
 0x211   :  { %v450_v30 = vadd.f32 %v449_v29, %v1935_v45  ;;  %1471 = vmatpush3.msra.mxu1 %v455_v25  ;;  %1535 = vmatprep.subr.mxu0 %v1645_v57 }
 0x212   :  { %1472 = vmatprep.subr.mxu1 %v1645_v57 }
 0x213   :  { %1473 = vmatpush3.msra.mxu1 %v450_v30 }
 0x214   :  { %1474 = vmatprep.subr.mxu1 %v1645_v57  ;;  %1536 = vmatpush3.xpose.msk.msra.mxu0 %vm174_vm1, %v540_v63 }
 0x215   :  { %1475 = vmatpush3.msra.mxu1 %v445_v31  ;;  %1537 = vmatprep.subr.mxu0 %v1645_v57 }
 0x216   :  { %1476 = vmatprep.subr.mxu1 %v1645_v57 }
 0x217   :  { %1477 = vmatpush3.msra.mxu1 %v440_v32 }
 0x218   :  { %1478 = vmatprep.subr.mxu1 %v1645_v57  ;;  %1538 = vmatpush3.xpose.msk.msra.mxu0 %vm174_vm1, %v1954_v1 }
 0x219   :  { %1479 = vmatpush3.msra.mxu1 %v435_v37  ;;  %1539 = vmatprep.subr.mxu0 %v1645_v57 }
 0x21a   :  { %1480 = vmatprep.subr.mxu1 %v1645_v57 }
 0x21b   :  { %1481 = vmatpush3.msra.mxu1 %v430_v38 }
 0x21c   :  { %1482 = vmatprep.subr.mxu1 %v1645_v57  ;;  %1540 = vmatpush3.xpose.msk.msra.mxu0 %vm174_vm1, %v1962_v27  ;;  %v46_v27 = vld [vmem:[%s2154_s2 + $0x90] sm:$0xff] }
 0x21d   :  { %1483 = vmatpush3.msra.mxu1 %v425_v40  ;;  %1541 = vmatprep.subr.mxu0 %v1645_v57 }
 0x21e   :  { %1484 = vmatprep.subr.mxu1 %v1645_v57 }
 0x21f   :  { %1485 = vmatpush3.msra.mxu1 %v420_v41 }
 0x220   :  { %1487 = vmatmul.mubr.msk.f32.vlgmr.msra.gmra.mxu1 %vm598_vm5, %v596_v42  ;;  %1508 = vmatprep.subr.mxu1 %v1645_v57 }
 0x221   :  { %1542 = vmatpush3.xpose.msk.msra.mxu0 %vm174_vm1, %v1968_v2  ;;  %1509 = vmatpush3.xpose.msk.msra.mxu1 %vm174_vm1, %v455_v25  ;;  %v44_v2 = vld [vmem:[%s2154_s2 + $0x80] sm:$0xff] }
 0x222   :  { %1510 = vmatprep.subr.mxu1 %v1645_v57  ;;  %1524 = vmatprep.mubr.msk.f32.mxu1 %vm1646_vm3, %v1645_v57 }
 0x223   :  { %1565 = vmatprep.subr.mxu0 %v1645_v57 }
 0x225   :  { %1511 = vmatpush3.xpose.msk.msra.mxu1 %vm174_vm1, %v450_v30 }
 0x226   :  { %1512 = vmatprep.subr.mxu1 %v1645_v57 }
 0x229   :  { %1513 = vmatpush3.xpose.msk.msra.mxu1 %vm174_vm1, %v445_v31 }
 0x22a   :  { %1514 = vmatprep.subr.mxu1 %v1645_v57 }
 0x22d   :  { %1515 = vmatpush3.xpose.msk.msra.mxu1 %vm174_vm1, %v440_v32  ;;  %v981_v32 = vsub.s32 3, %v1898_v34 }
 0x22e   :  { %1516 = vmatprep.subr.mxu1 %v1645_v57 }
 0x22f   :  { %v982_v33 = vrot.slane %v1906_v36, %v981_v32 }
 0x231   :  { %1517 = vmatpush3.xpose.msk.msra.mxu1 %vm174_vm1, %v435_v37 }
 0x232   :  { %1518 = vmatprep.subr.mxu1 %v1645_v57 }
 0x235   :  { %1519 = vmatpush3.xpose.msk.msra.mxu1 %vm174_vm1, %v430_v38 }
 0x236   :  { %1520 = vmatprep.subr.mxu1 %v1645_v57 }
 0x239   :  { %1521 = vmatpush3.xpose.msk.msra.mxu1 %vm174_vm1, %v425_v40 }
 0x23a   :  { %1522 = vmatprep.subr.mxu1 %v1645_v57 }
 0x23d   :  { %1523 = vmatpush3.xpose.msk.msra.mxu1 %vm174_vm1, %v420_v41 }
 0x23e   :  { %1546 = vmatprep.subr.mxu1 %v1645_v57 }
 0x2c3   :  { %v741_v35 = vpop.f32.mrf.mxu0 }
 0x2c4   :  { %v749_v43 = vsel %vm745_vm6, %v741_v35, -inf }
 0x2c5   :  { %750 = vmax.xlane.f32.xlu0 %v749_v43  ;;  %v1507_v44 = vpop.f32.mrf.mxu0 }
 0x2e0   :  { %v668_v45 = vpop.f32.mrf.mxu1 }
 0x2e1   :  { %v746_v46 = vsel %vm745_vm6, %v668_v45, -inf }
 0x2e2   :  { %747 = vmax.xlane.f32.xlu1 %v746_v46  ;;  %v1488_v47 = vpop.f32.mrf.mxu1  ;;  %v51_v46 = vld [vmem:[%s2154_s2 + $0xb8] sm:$0xff] }
 0x2e3   :  { %v50_v47 = vld [vmem:[%s2154_s2 + $0xb0] sm:$0xff] }
 0x34e   :  { %v751_v48 = vpop.xlane.xlu0 %750 }
 0x34f   :  { %v753_v49 = vsub.f32 %v741_v35, %v751_v48  ;;  %v48_v48 = vld [vmem:[%s2154_s2 + $0xa0] sm:$0xff] }
 0x351   :  { %v756_v52 = vmul.f32 1.442695, %v753_v49 }
 0x36b   :  { %v748_v50 = vpop.xlane.xlu1 %747 }
 0x36c   :  { %v752_v51 = vsub.f32 %v668_v45, %v748_v50 }
 0x36e   :  { %v754_v53 = vmul.f32 1.442695, %v752_v51 }
 0x370   :  { %1609 = vpow2.f32 %v754_v53  ;;  %v1080_v53 = vsub.s32 5, %v1898_v34 }
 0x371   :  { %1611 = vpow2.f32 %v756_v52  ;;  %v1075_v52 = vsub.s32 4, %v1898_v34 }
 0x37d   :  { %v1610_v54 = vpop.eup %1609 }
 0x37e   :  { %v758_v55 = vsel %vm745_vm6, %v1610_v54, 0.0  ;;  %v1612_v56 = vpop.eup %1611 }
 0x37f   :  { %759 = vadd.xlane.f32.xlu1 %v758_v55  ;;  %v761_v58 = vsel %vm745_vm6, %v1612_v56, 0.0 }
 0x383   :  { %762 = vadd.xlane.f32.xlu1 %v761_v58  ;;  %v1081_v58 = vrot.slane %v1906_v36, %v1080_v53 }
 0x408   :  { %v760_v59 = vpop.xlane.xlu1 %759 }
 0x409   :  { %1613 = vrcp.f32 %v760_v59 }
 0x40c   :  { %v763_v60 = vpop.xlane.xlu1 %762 }
 0x40d   :  { %1615 = vrcp.f32 %v763_v60 }
 0x416   :  { %v1614_v61 = vpop.eup %1613 }
 0x417   :  { %v766_v62 = vmul.f32 %v1614_v61, %v1610_v54  ;;  %v1076_v54 = vrot.slane %v1906_v36, %v1075_v52  ;;  %v59_v61 = vld [vmem:[%s2154_s2 + $0xf8] sm:$0xff] }
 0x419   :  { %1525 = vmatmul.mubr.msk.f32.vlgmr.msra.gmra.mxu1 %vm174_vm1, %v766_v62  ;;  %v58_v62 = vld [vmem:[%s2154_s2 + $0xf0] sm:$0xff] }
 0x41a   :  { %v1616_v63 = vpop.eup %1615  ;;  %1562 = vmatprep.mubr.msk.f32.mxu1 %vm1646_vm3, %v1645_v57  ;;  %1547 = vmatpush3.msra.mxu1 %v47_v28  ;;  %v55_v28 = vld [vmem:[%s2154_s2 + $0xd8] sm:$0xff] }
 0x41b   :  { %v767_v1 = vmul.f32 %v1616_v63, %v1612_v56  ;;  %1548 = vmatprep.subr.mxu1 %v1645_v57  ;;  %v57_v63 = vld [vmem:[%s2154_s2 + $0xe8] sm:$0xff] }
 0x41c   :  { %1549 = vmatpush3.msra.mxu1 %v46_v27  ;;  %v54_v27 = vld [vmem:[%s2154_s2 + $0xd0] sm:$0xff] }
 0x41d   :  { %1544 = vmatmul.mubr.msk.f32.vlgmr.msra.gmra.mxu0 %vm174_vm1, %v767_v1  ;;  %1550 = vmatprep.subr.mxu1 %v1645_v57  ;;  %v56_v1 = vld [vmem:[%s2154_s2 + $0xe0] sm:$0xff] }
 0x41e   :  { %1573 = vmatprep.mubr.msk.f32.mxu0 %vm1646_vm3, %v1645_v57  ;;  %1551 = vmatpush3.msra.mxu1 %v45_v26  ;;  %v53_v26 = vld [vmem:[%s2154_s2 + $0xc8] sm:$0xff] }
 0x41f   :  { %1552 = vmatprep.subr.mxu1 %v1645_v57  ;;  %1566 = vmatpush3.msra.mxu0 %v51_v46 }
 0x420   :  { %1553 = vmatpush3.msra.mxu1 %v44_v2  ;;  %1567 = vmatprep.subr.mxu0 %v1645_v57  ;;  %v52_v2 = vld [vmem:[%s2154_s2 + $0xc0] sm:$0xff] }
 0x421   :  { %1554 = vmatprep.subr.mxu1 %v1645_v57  ;;  %1568 = vmatpush3.msra.mxu0 %v50_v47 }
 0x422   :  { %1555 = vmatpush3.msra.mxu1 %v43_v3  ;;  %1569 = vmatprep.subr.mxu0 %v1645_v57  ;;  %v1085_v3 = vsub.s32 6, %v1898_v34 }
 0x423   :  { %1556 = vmatprep.subr.mxu1 %v1645_v57 }
 0x424   :  { %1557 = vmatpush3.msra.mxu1 %v42_v4  ;;  %v1086_v4 = vrot.slane %v1906_v36, %v1085_v3 }
 0x425   :  { %1558 = vmatprep.subr.mxu1 %v1645_v57 }
 0x426   :  { %1559 = vmatpush3.msra.mxu1 %v41_v5 }
 0x427   :  { %1560 = vmatprep.subr.mxu1 %v1645_v57 }
 0x428   :  { %1561 = vmatpush3.msra.mxu1 %v40_v6 }
 0x4d9   :  { %v861_v8 = vpop.f32.mrf.mxu1 }
 0x4da   :  { %v962_v9 = vmul.f32 %v861_v8, %v61_v7 }
 0x4db   :  { %v1526_v10 = vpop.f32.mrf.mxu1 }
 0x4dc   :  { %v965_v11 = vsel %vm964_vm7, %v962_v9, 0.0 }
 0x4dd   :  { %v966_v12 = vrot.slane %v965_v11, 4  ;;  %v958_v13 = vpop.f32.mrf.mxu0 }
 0x4de   :  { %v963_v14 = vmul.f32 %v958_v13, %v61_v7 }
 0x4df   :  { %v967_v15 = vadd.f32 %v966_v12, %v965_v11  ;;  %v1545_v16 = vpop.f32.mrf.mxu0 }
 0x4e0   :  { %v972_v17 = vsel %vm964_vm7, %v963_v14, 0.0 }
 0x4e1   :  { %v968_v18 = vrot.slane %v967_v15, 2  ;;  %v973_v19 = vrot.slane %v972_v17, 4 }
 0x4e3   :  { %v969_v20 = vadd.f32 %v968_v18, %v967_v15  ;;  %v974_v21 = vadd.f32 %v973_v19, %v972_v17 }
 0x4e5   :  { %v975_v22 = vrot.slane %v974_v21, 2  ;;  %v970_v23 = vrot.slane %v969_v20, 1 }
 0x4e7   :  { %v976_v24 = vadd.f32 %v975_v22, %v974_v21  ;;  %v971_v29 = vadd.f32 %v970_v23, %v969_v20 }
 0x4e9   :  { %v977_v25 = vrot.slane %v976_v24, 1 }
 0x4eb   :  { %v978_v30 = vadd.f32 %v977_v25, %v976_v24 }
 0x4ed   :  { %v986_v31 = vsel %vm985_vm8, %v978_v30, %v971_v29  ;;  %v1649_v30 = vmov -1.0  }
 0x4ee   :  { %1563 = vmatmul.mubr.msk.f32.vlgmr.msra.gmra.mxu1 %vm598_vm5, %v986_v31 }
 0x5ae   :  { %v1055_v37 = vpop.f32.mrf.mxu1 }
 0x5af   :  { %v1056_v38 = vadd.f32 %v1055_v37, %v982_v33 }
 0x5b0   :  { %v1564_v39 = vpop.f32.mrf.mxu1 }
 0x5b1   :  { %v1059_v40 = vadd.f32 %v1056_v38, %v1674_v0  ;;  %v49_v0 = vld [vmem:[%s2154_s2 + $0xa8] sm:$0xff]  ;;  %v1189_v39 = vsub.s32 7, %v1898_v34  ;;  %s1650_s2 = smov [#allocation2]  }
 0x5b2   :  { %1570 = vmatpush3.msra.mxu0 %v49_v0  ;;  %s1271_s9 = sshll.u32 %s1650_s2, 4  ;;  %s1272_s9 = int_to_ptr.vmem [resolvable:$true] %s1271_s9 }
 0x5b3   :  { %v1060_v41 = vsel %vm71_vm0, %v1059_v40, 0.0  ;;  %1571 = vmatprep.subr.mxu0 %v1645_v57  ;;  %s1623_s1 = scalar_lea.vmem %s1272_s9, 32  ;;  %p1628_p1 = scmp.lt.s32.totalorder %s1272_s9, %s1272_s9 }
 0x5b4   :  { %1061 = vadd.xlane.f32.xlu1 %v1060_v41  ;;  %1572 = vmatpush3.msra.mxu0 %v48_v48  ;;  %p1624_p0 = scmp.ne.s32.totalorder %s1272_s9, %s1623_s1  ;;  %p1629_p2 = scmp.lt.s32.totalorder %s1623_s1, %s1623_s1 }
 0x5b5   :  { %1576 = vmatprep.subr.mxu0 %v1645_v57 }
 0x5b6   :  { %p1630_p3 = por %p1629_p2, %p1628_p1 }
 0x5b8   :  { %p1631_p4 = pnand %p1630_p3, %p1624_p0 }
 0x63d   :  { %v1062_v42 = vpop.xlane.xlu1 %1061 }
 0x63e   :  { %v1063_v35 = vmul.f32 0.03125, %v1062_v42 }
 0x640   :  { %v1064_v43 = vsub.f32 %v1059_v40, %v1063_v35  ;;  %v1190_v40 = vrot.slane %v1906_v36, %v1189_v39 }
 0x642   :  { %v1065_v44 = vmul.f32 %v1064_v43, %v1064_v43 }
 0x644   :  { %v1066_v45 = vsel %vm71_vm0, %v1065_v44, 0.0 }
 0x645   :  { %1067 = vadd.xlane.f32.xlu1 %v1066_v45 }
 0x6ce   :  { %v1068_v49 = vpop.xlane.xlu1 %1067 }
 0x6cf   :  { %v1069_v50 = vmul.f32 0.03125, %v1068_v49 }
 0x6d1   :  { %v1070_v51 = vadd.f32 1e-05, %v1069_v50 }
 0x6d3   :  { %1617 = vrsqrt.f32 %v1070_v51 }
 0x6e0   :  { %v1618_v55 = vpop.eup %1617 }
 0x6e1   :  { %v1072_v56 = vmul.f32 %v1618_v55, %v1064_v43 }
 0x6e3   :  { %v1077_v59 = vmul.f32 %v1076_v54, %v1072_v56 }
 0x6e5   :  { %v1082_v60 = vadd.f32 %v1081_v58, %v1077_v59 }
 0x6e7   :  { %1574 = vmatmul.mubr.msk.f32.vlgmr.msra.gmra.mxu0 %vm100_vm4, %v1082_v60 }
 0x6e8   :  { %1592 = vmatprep.mubr.msk.f32.mxu0 %vm1646_vm3, %v1645_v57  ;;  %1577 = vmatpush3.msra.mxu0 %v59_v61 }
 0x6e9   :  { %1578 = vmatprep.subr.mxu0 %v1645_v57 }
 0x6ea   :  { %1579 = vmatpush3.msra.mxu0 %v58_v62 }
 0x6eb   :  { %1580 = vmatprep.subr.mxu0 %v1645_v57 }
 0x6ec   :  { %1581 = vmatpush3.msra.mxu0 %v57_v63 }
 0x6ed   :  { %1582 = vmatprep.subr.mxu0 %v1645_v57 }
 0x6ee   :  { %1583 = vmatpush3.msra.mxu0 %v56_v1 }
 0x6ef   :  { %1584 = vmatprep.subr.mxu0 %v1645_v57 }
 0x6f0   :  { %1585 = vmatpush3.msra.mxu0 %v55_v28 }
 0x6f1   :  { %1586 = vmatprep.subr.mxu0 %v1645_v57 }
 0x6f2   :  { %1587 = vmatpush3.msra.mxu0 %v54_v27 }
 0x6f3   :  { %1588 = vmatprep.subr.mxu0 %v1645_v57 }
 0x6f4   :  { %1589 = vmatpush3.msra.mxu0 %v53_v26 }
 0x6f5   :  { %1590 = vmatprep.subr.mxu0 %v1645_v57 }
 0x6f6   :  { %1591 = vmatpush3.msra.mxu0 %v52_v2 }
 0x7a7   :  { %v1156_v5 = vpop.f32.mrf.mxu0 }
 0x7a8   :  { %v1157_v6 = vadd.f32 %v1156_v5, %v1086_v4 }
 0x7a9   :  { %v1575_v7 = vpop.f32.mrf.mxu0 }
 0x7aa   :  { %v1161_v8 = vmul.f32 0.70710677, %v1157_v6  ;;  %v1160_v33 = vmul.f32 0.5, %v1157_v6 }
 0x7ac   :  { %v1164_v9 = vand.u32 2147483647, %v1161_v8  ;;  %vm1162_vm9 = vcmp.ge.f32.partialorder %v1161_v8, 0.0 }
 0x7ad   :  { %v1163_v31 = vsel %vm1162_vm9, 1.0, %v1649_v30 }
 0x7ae   :  { %v1165_v10 = vmul.f32 0.3275911, %v1164_v9  ;;  %v1178_v12 = vsub.f32 0.0, %v1164_v9 }
 0x7b0   :  { %v1166_v11 = vadd.f32 1.0, %v1165_v10  ;;  %v1179_v13 = vmul.f32 %v1178_v12, %v1164_v9 }
 0x7b2   :  { %1619 = vrcp.f32 %v1166_v11  ;;  %v1180_v16 = vmul.f32 1.442695, %v1179_v13 }
 0x7b4   :  { %1621 = vpow2.f32 %v1180_v16 }
 0x7bf   :  { %v1620_v14 = vpop.eup %1619 }
 0x7c0   :  { %v1169_v15 = vmul.f32 1.0614054, %v1620_v14 }
 0x7c1   :  { %v1622_v24 = vpop.eup %1621 }
 0x7c2   :  { %v1170_v17 = vadd.f32 -1.4531521, %v1169_v15 }
 0x7c4   :  { %v1171_v57 = vmul.f32 %v1620_v14, %v1170_v17 }
 0x7c6   :  { %v1172_v18 = vadd.f32 1.4214138, %v1171_v57 }
 0x7c8   :  { %v1173_v19 = vmul.f32 %v1620_v14, %v1172_v18 }
 0x7ca   :  { %v1174_v20 = vadd.f32 -0.28449672, %v1173_v19 }
 0x7cc   :  { %v1175_v21 = vmul.f32 %v1620_v14, %v1174_v20 }
 0x7ce   :  { %v1176_v22 = vadd.f32 0.2548296, %v1175_v21 }
 0x7d0   :  { %v1177_v23 = vmul.f32 %v1620_v14, %v1176_v22 }
 0x7d2   :  { %v1182_v25 = vmul.f32 %v1622_v24, %v1177_v23 }
 0x7d4   :  { %v1183_v29 = vsub.f32 1.0, %v1182_v25 }
 0x7d6   :  { %v1184_v32 = vmul.f32 %v1183_v29, %v1163_v31 }
 0x7d8   :  { %v1185_v37 = vadd.f32 1.0, %v1184_v32 }
 0x7da   :  { %v1186_v38 = vmul.f32 %v1185_v37, %v1160_v33 }
 0x7dc   :  { %1593 = vmatmul.mubr.msk.f32.vlgmr.msra.gmra.mxu0 %vm598_vm5, %v1186_v38 }
 0x89c   :  { %v1260_v41 = vpop.f32.mrf.mxu0 }
 0x89d   :  { %v1261_v42 = vadd.f32 %v1260_v41, %v1190_v40 }
 0x89e   :  { %v1594_v35 = vpop.f32.mrf.mxu0 }
 0x89f   :  { %1264 = vst.msk [vmem:[#allocation2] sm:$0x3] %vm71_vm0, %v1261_v42 }
 0x8a0   :  { %1634 = shalt.err (!%p1631_p4)
}
 0x8a1   :  { %1274 = dma.vmem_to_hbm [thread:$0]  %s1272_s9, 32, %s2155_s3, [#allocation3]  }
 0x8a2   :  { %1643 = dma.done.wait [#allocation3], 32  }
 0x8a3   :  { %1644 = vsyncadd [#allocation3], 4294967264 }
 0x8a4   :  { %1278 = vsyncpa [#allocation3], 1 }

</bundles_post_ra>
